<compile_context>
chip_gen: v5e
topology: v5e:2x2
jax: 0.10.0
libtpu: 0.0.40
codegen_flags: <defaults>
</compile_context>

<pallas_src>
import jax
import jax.numpy as jnp
from jax.experimental import pallas as pl
from jax.experimental.pallas import tpu as pltpu


def _head_kernel(x_ref, o_ref):
    # x_ref: (1, A, bbox_attrs, H*W)  -- one batch element's full channel slab
    # o_ref: (1, A, H*W, bbox_attrs)
    # Single batched 2-D transpose of the last two dims (XLU work, hidden
    # under the HBM DMAs of neighbouring grid steps).
    o_ref[...] = jnp.transpose(x_ref[...], (0, 1, 3, 2))


def head_forward(net_out, num_anchors, num_classes):
    """YOLOv3 head: (bs, A*bbox, H, W) -> (bs, A, H, W, bbox)."""
    bbox_attrs = 5 + num_classes
    bs, c, h, w = net_out.shape
    assert c == num_anchors * bbox_attrs, "channel dim mismatch"
    hw = h * w

    # Free contiguous view: lane-dense input (last dim = H*W).
    x = net_out.reshape(bs, num_anchors, bbox_attrs, hw)

    # Last two block dims equal the full array dims, so the (8,128) divisibility
    # rule is satisfied for arbitrary YOLO sizes (13/26/52, bbox=85, ...).
    in_spec = pl.BlockSpec(
        (1, num_anchors, bbox_attrs, hw),
        lambda b: (b, 0, 0, 0),
    )
    out_spec = pl.BlockSpec(
        (1, num_anchors, hw, bbox_attrs),
        lambda b: (b, 0, 0, 0),
    )

    out = pl.pallas_call(
        _head_kernel,
        out_shape=jax.ShapeDtypeStruct(
            (bs, num_anchors, hw, bbox_attrs), net_out.dtype
        ),
        grid_spec=pltpu.PrefetchScalarGridSpec(
            num_scalar_prefetch=0,
            grid=(bs,),
            in_specs=[in_spec],
            out_specs=out_spec,
        ),
        compiler_params=pltpu.CompilerParams(
            dimension_semantics=("parallel",),
        ),
    )(x)

    # Free reshape back to the exact PyTorch output layout.
    return out.reshape(bs, num_anchors, h, w, bbox_attrs)


def head_reference(net_out, num_anchors, num_classes):
    """Pure-JAX reference matching the PyTorch module exactly."""
    bbox_attrs = 5 + num_classes
    bs, _, h, w = net_out.shape
    pred = net_out.reshape(bs, num_anchors, bbox_attrs, h, w)
    return jnp.transpose(pred, (0, 1, 3, 4, 2))


if __name__ == "__main__":
    key = jax.random.PRNGKey(0)
    k1, k2 = jax.random.split(key)

    # --- Test 1: small aligned shapes (A=3, classes=3 -> bbox=8, 16x16, bs=2)
    num_anchors, num_classes = 3, 3
    bs, h, w = 2, 16, 16
    c = num_anchors * (5 + num_classes)
    net_out = jax.random.normal(k1, (bs, c, h, w), dtype=jnp.float32)

    out = jax.block_until_ready(head_forward(net_out, num_anchors, num_classes))
    ref = head_reference(net_out, num_anchors, num_classes)
    assert out.shape == (bs, num_anchors, h, w, 5 + num_classes), out.shape
    assert out.dtype == net_out.dtype
    assert jnp.array_equal(out, ref), "Pallas output mismatch vs reference (test 1)"

    # --- Test 2: real YOLO-like shapes (A=3, classes=80 -> bbox=85, 13x13, bs=1)
    # Exercises odd spatial size (masked lanes) and bbox=85 (unaligned sublanes).
    num_anchors2, num_classes2 = 3, 80
    bs2, h2, w2 = 1, 13, 13
    c2 = num_anchors2 * (5 + num_classes2)  # 255
    net_out2 = jax.random.normal(k2, (bs2, c2, h2, w2), dtype=jnp.float32)

    out2 = jax.block_until_ready(
        head_forward(net_out2, num_anchors2, num_classes2)
    )
    ref2 = head_reference(net_out2, num_anchors2, num_classes2)
    assert out2.shape == (bs2, num_anchors2, h2, w2, 5 + num_classes2), out2.shape
    assert out2.dtype == net_out2.dtype
    assert jnp.array_equal(out2, ref2), "Pallas output mismatch vs reference (test 2)"

    print("KERNEL_OK")
</pallas_src>

<mosaic_0001>
module attributes {stable_mosaic.version = 11 : i64} {
  func.func @_head_kernel(%arg0: i32, %arg1: memref<1x3x8x256xf32, #tpu.memory_space<vmem>>, %arg2: memref<1x3x256x8xf32, #tpu.memory_space<vmem>>) attributes {dimension_semantics = [#tpu.dimension_semantics<parallel>], iteration_bounds = array<i64: 2>, scalar_prefetch = 0 : i64, scratch_operands = 0 : i64, tpu.core_type = #tpu.core_type<tc>, window_params = [{transform_indices = @transform_0, window_bounds = array<i64: 1, 3, 8, 256>}, {transform_indices = @transform_1, window_bounds = array<i64: 1, 3, 256, 8>}]} {
    %c0 = arith.constant 0 : index
    %c0_0 = arith.constant 0 : index
    %c0_1 = arith.constant 0 : index
    %c0_2 = arith.constant 0 : index
    %0 = vector.load %arg1[%c0, %c0_0, %c0_1, %c0_2] : memref<1x3x8x256xf32, #tpu.memory_space<vmem>>, vector<1x3x8x256xf32>
    %1 = tpu.transpose %0, [0, 1, 3, 2] : vector<1x3x8x256xf32> -> vector<1x3x256x8xf32>
    %c0_3 = arith.constant 0 : index
    %c0_4 = arith.constant 0 : index
    %c0_5 = arith.constant 0 : index
    %c0_6 = arith.constant 0 : index
    %2 = vector.load %arg2[%c0_3, %c0_4, %c0_5, %c0_6] : memref<1x3x256x8xf32, #tpu.memory_space<vmem>>, vector<1x3x256x8xf32>
    tpu.vector_store %arg2[%c0_3, %c0_4, %c0_5, %c0_6], %1 {strides = array<i32>} : memref<1x3x256x8xf32, #tpu.memory_space<vmem>>, vector<1x3x256x8xf32>,
    return
  }
  func.func @transform_0(%arg0: i32) -> (i32, i32, i32, i32) {
    %c0_i32 = arith.constant 0 : i32
    %c0_i32_0 = arith.constant 0 : i32
    %c0_i32_1 = arith.constant 0 : i32
    %c0_i32_2 = arith.constant 0 : i32
    return %arg0, %c0_i32, %c0_i32_0, %c0_i32_1 : i32, i32, i32, i32
  }
  func.func @transform_1(%arg0: i32) -> (i32, i32, i32, i32) {
    %c0_i32 = arith.constant 0 : i32
    %c0_i32_0 = arith.constant 0 : i32
    %c0_i32_1 = arith.constant 0 : i32
    %c0_i32_2 = arith.constant 0 : i32
    return %arg0, %c0_i32, %c0_i32_0, %c0_i32_1 : i32, i32, i32, i32
  }
}

</mosaic_0001>

<bundles_post_ra>
// kernel: tpu_custom_call.1
= control target key start
LH: loop header
LB: loop body
LE: loop exit
PB: predicated region body
PF: predicated region fallthrough
CT: control target
= control target key end

     0   :  { %6 = vsyncpa [#allocation3], 0  ;;  %s913_s0 = inlined_call_operand.hbm [shape: f32[2,3,8,256], index: 0, kind: input, shape index: {}]   ;;  %s914_s1 = inlined_call_operand.vmem [shape: f32[2,3,256,8], index: 1, kind: output, shape index: {}]  }
   0x1   :  { %8 = vsyncpa [#allocation3 + $0x1], 0  ;;  %s633_s6 = smov 0   ;;  %s635_s7 = smov 0  }
   0x2   :  { %s637_s8 = smov 0   ;;  %s639_s9 = smov 0  }
   0x3 LB: > { %s652_s10 = sadd.s32 4294967295, %s619_s9   ;;  %s655_s11 = sadd.s32 1, %s619_s9   ;;  %s619_s9 = sphi %s639_s9, %s920_s9   ;;  %s615_s8 = sphi %s637_s8, %s919_s8   ;;  %s611_s7 = sphi %s635_s7, %s918_s7   ;;  %s607_s6 = sphi %s633_s6, %s917_s6  }
   0x4   : > { %s18_s12 = ssub.s32 %s619_s9, %s655_s11  ;;  %s21_s13 = sadd.s32 1, %s615_s8 }
   0x5   : > { %p19_p0 = scmp.eq.s32.totalorder %s18_s12, 0  ;;  %p28_p1 = scmp.ne.s32.totalorder %s615_s8, %s611_s7 }
   0x6   : > { %p29_p2 = scmp.eq.s32.totalorder %s619_s9, 0  ;;  %p34_p3 = scmp.ne.s32.totalorder %s611_s7, %s607_s6 }
   0x7   : > { %s665_s14 = scalar_select %p19_p0, %s615_s8, %s21_s13  }
   0x8   : > { %p30_p4 = por %p29_p2, %p28_p1  ;;  %p35_p5 = scmp.eq.s32.totalorder %s652_s10, 0 }
   0x9   : > { %p519_p6 = scmp.lt.s32.totalorder %s619_s9, 2  ;;  %s84_s16 = sand.u32 1, %s615_s8  }
   0xa   : > { %p669_p7 = por %p35_p5, %p34_p3  ;;  %s509_s17 = smul.u32 48, %s84_s16 }
   0xb   : > { %s510_s18 = smul.u32 48, %s619_s9  ;;  %p675_p8 = pnand %p519_p6, %p30_p4 }
   0xc   : > { %s88_s23 = scalar_lea.vmem [#allocation2], %s509_s17  ;;  %p505_p9 = scmp.ge.s32.totalorder %s619_s9, 1 }
   0xd   : > { %s93_s22 = scalar_lea.hbm %s913_s0, %s510_s18  ;;  %s96_s24 = sshll.u32 %s88_s23, 4  ;;  %s97_s24 = int_to_ptr.vmem [resolvable:$true] %s96_s24 }
   0xe   : > { %s94_s25 = sshll.u32 %s93_s22, 4  ;;  %s85_s26 = scalar_lea.sflag [#allocation3], %s84_s16  ;;  %s95_s25 = int_to_ptr.hbm [resolvable:$true] %s94_s25 }
   0xf   : > { %s555_s27 = sshra.s32 %s95_s25, 4  ;;  %p559_p11 = pneg %p675_p8  ;;  %s556_s27 = int_to_ptr.hbm [resolvable:$true] %s555_s27 }
  0x10   : > { %s557_s28 = scalar_lea.hbm %s556_s27, 48  ;;  %s562_s2 = scalar_lea.hbm %s913_s0, 96 }
  0x11   : > { %p558_p10 = scmp.ne.s32.totalorder %s556_s27, %s557_s28  ;;  %p563_p0 = scmp.lt.s32.totalorder %s556_s27, %s913_s0 }
  0x12   : > { %p564_p1 = scmp.lt.s32.totalorder %s562_s2, %s557_s28 }
  0x13   : > { %p560_p12 = pnand %p559_p11, %p558_p10 }
  0x14   : > { %p565_p2 = por %p564_p1, %p563_p0 }
  0x15   : > { %p561_p13 = pneg %p560_p12 }
  0x17   : > { %p566_p3 = pnand %p565_p2, %p561_p13 }
  0x19   : > { %569 = shalt.err (!%p566_p3)
}
  0x1a   : > { %s621_s5 = smov 256   ;;  %s622_s6 = smov 16  }
  0x1b   : > { %518 = dma.hbm_to_vmem [thread:$0]  (!%p675_p8), %s95_s25, 768, %s97_s24, %s85_s26, %s621_s5, %s621_s5, %s622_s6  }
  0x1c   : > { %p104_p4 = scmp.lt.s32.totalorder %s619_s9, 3 }
  0x1e   : > { %p105_p5 = pnand %p505_p9, %p104_p4 }
  0x1f   : > { %s110_s12 = sand.u32 (!%p105_p5), 1, %s611_s7  }
  0x20   : > { %108 = sbr.rel (%p105_p5) target bundleno = 454 (0x1c6), region = 24  ;;  %s111_s16 = scalar_lea.sflag (!%p105_p5), [#allocation3], %s110_s12 }
  0x21   : > { %s511_s13 = smul.u32 (!%p105_p5), 48, %s110_s12 }
  0x23   : > { %s114_s17 = scalar_lea.vmem (!%p105_p5), [#allocation2], %s511_s13 }
  0x25   : > { %602 = dma.done.wait (%p669_p7), %s111_s16, 768  }
  0x26   : > { %604 = vsyncadd (%p669_p7), %s111_s16, 4294966528  ;;  %v141_v0 = vld [vmem:[%s114_s17 + $0x10] sm:$0xff]  ;;  %v139_v1 = vld [vmem:[%s114_s17] sm:$0xff]  ;;  %p134_p6 = scmp.lt.s32.totalorder %s652_s10, 1  ;;  %vm337_vm0 = vcmask 64512  }
  0x27   : > { %v143_v2 = vld [vmem:[%s114_s17 + $0x20] sm:$0xff]  ;;  %209 = vxpose.xlu1.b32.start.end [1/1] (short) %v141_v0, 128  ;;  %145 = vxpose.xlu0.b32.start.end [1/1] (short) %v139_v1, 128  ;;  %v142_v3 = vld [vmem:[%s114_s17 + $0x18] sm:$0xff]  ;;  %v140_v4 = vld [vmem:[%s114_s17 + $0x8] sm:$0xff] }
  0x28   : > { %273 = vxpose.xlu2.b32.start.end [1/1] (short) %v143_v2, 128  ;;  %v144_v5 = vld [vmem:[%s114_s17 + $0x28] sm:$0xff]  ;;  %s922_s10 = smov (!%p134_p6, %s652_s10), 1 }
  0x29   : > { %s512_s9 = smul.u32 768, %s922_s10 }
  0x2b   : > { %s706_s19 = scalar_lea.vmem %s914_s1, %s512_s9 }
  0xa7   : > { %241 = vxpose.xlu1.b32.start.end [1/1] (short) %v142_v3, 128  ;;  %177 = vxpose.xlu0.b32.start.end [1/1] (short) %v140_v4, 128 }
  0xa8   : > { %305 = vxpose.xlu2.b32.start.end [1/1] (short) %v144_v5, 128 }
  0xc1   : > { %v289_v6 = vpop.trf.xlu2 }
  0xc2   : > { %402 = vst.msk [vmem:[%s706_s19 + $0x200] sm:$0xff] %vm337_vm0, %v289_v6 }
  0xc9   : > { %v290_v7 = vpop.trf.xlu2 }
  0xca   : > { %403 = vst.msk [vmem:[%s706_s19 + $0x208] sm:$0xff] %vm337_vm0, %v290_v7 }
  0xcb   : > { %v225_v8 = vpop.trf.xlu1  ;;  %v161_v9 = vpop.trf.xlu0 }
  0xcc   : > { %370 = vst.msk [vmem:[%s706_s19 + $0x100] sm:$0xff] %vm337_vm0, %v225_v8 }
  0xcd   : > { %338 = vst.msk [vmem:[%s706_s19] sm:$0xff] %vm337_vm0, %v161_v9 }
  0xd1   : > { %v291_v10 = vpop.trf.xlu2 }
  0xd2   : > { %404 = vst.msk [vmem:[%s706_s19 + $0x210] sm:$0xff] %vm337_vm0, %v291_v10 }
  0xd3   : > { %v226_v11 = vpop.trf.xlu1  ;;  %v162_v12 = vpop.trf.xlu0 }
  0xd4   : > { %371 = vst.msk [vmem:[%s706_s19 + $0x108] sm:$0xff] %vm337_vm0, %v226_v11 }
  0xd5   : > { %339 = vst.msk [vmem:[%s706_s19 + $0x8] sm:$0xff] %vm337_vm0, %v162_v12 }
  0xd9   : > { %v292_v13 = vpop.trf.xlu2 }
  0xda   : > { %405 = vst.msk [vmem:[%s706_s19 + $0x218] sm:$0xff] %vm337_vm0, %v292_v13 }
  0xdb   : > { %v227_v14 = vpop.trf.xlu1  ;;  %v163_v15 = vpop.trf.xlu0 }
  0xdc   : > { %372 = vst.msk [vmem:[%s706_s19 + $0x110] sm:$0xff] %vm337_vm0, %v227_v14 }
  0xdd   : > { %340 = vst.msk [vmem:[%s706_s19 + $0x10] sm:$0xff] %vm337_vm0, %v163_v15 }
  0xe1   : > { %v293_v16 = vpop.trf.xlu2 }
  0xe2   : > { %406 = vst.msk [vmem:[%s706_s19 + $0x220] sm:$0xff] %vm337_vm0, %v293_v16 }
  0xe3   : > { %v228_v17 = vpop.trf.xlu1  ;;  %v164_v18 = vpop.trf.xlu0 }
  0xe4   : > { %373 = vst.msk [vmem:[%s706_s19 + $0x118] sm:$0xff] %vm337_vm0, %v228_v17 }
  0xe5   : > { %341 = vst.msk [vmem:[%s706_s19 + $0x18] sm:$0xff] %vm337_vm0, %v164_v18 }
  0xe9   : > { %v294_v19 = vpop.trf.xlu2 }
  0xea   : > { %407 = vst.msk [vmem:[%s706_s19 + $0x228] sm:$0xff] %vm337_vm0, %v294_v19 }
  0xeb   : > { %v229_v20 = vpop.trf.xlu1  ;;  %v165_v21 = vpop.trf.xlu0 }
  0xec   : > { %374 = vst.msk [vmem:[%s706_s19 + $0x120] sm:$0xff] %vm337_vm0, %v229_v20 }
  0xed   : > { %342 = vst.msk [vmem:[%s706_s19 + $0x20] sm:$0xff] %vm337_vm0, %v165_v21 }
  0xf1   : > { %v295_v22 = vpop.trf.xlu2 }
  0xf2   : > { %408 = vst.msk [vmem:[%s706_s19 + $0x230] sm:$0xff] %vm337_vm0, %v295_v22 }
  0xf3   : > { %v230_v23 = vpop.trf.xlu1  ;;  %v166_v24 = vpop.trf.xlu0 }
  0xf4   : > { %375 = vst.msk [vmem:[%s706_s19 + $0x128] sm:$0xff] %vm337_vm0, %v230_v23 }
  0xf5   : > { %343 = vst.msk [vmem:[%s706_s19 + $0x28] sm:$0xff] %vm337_vm0, %v166_v24 }
  0xf9   : > { %v296_v25 = vpop.trf.xlu2 }
  0xfa   : > { %409 = vst.msk [vmem:[%s706_s19 + $0x238] sm:$0xff] %vm337_vm0, %v296_v25 }
  0xfb   : > { %v231_v26 = vpop.trf.xlu1  ;;  %v167_v27 = vpop.trf.xlu0 }
  0xfc   : > { %376 = vst.msk [vmem:[%s706_s19 + $0x130] sm:$0xff] %vm337_vm0, %v231_v26 }
  0xfd   : > { %344 = vst.msk [vmem:[%s706_s19 + $0x30] sm:$0xff] %vm337_vm0, %v167_v27 }
 0x101   : > { %v297_v28 = vpop.trf.xlu2 }
 0x102   : > { %410 = vst.msk [vmem:[%s706_s19 + $0x240] sm:$0xff] %vm337_vm0, %v297_v28 }
 0x103   : > { %v232_v29 = vpop.trf.xlu1  ;;  %v168_v30 = vpop.trf.xlu0 }
 0x104   : > { %377 = vst.msk [vmem:[%s706_s19 + $0x138] sm:$0xff] %vm337_vm0, %v232_v29 }
 0x105   : > { %345 = vst.msk [vmem:[%s706_s19 + $0x38] sm:$0xff] %vm337_vm0, %v168_v30 }
 0x109   : > { %v298_v31 = vpop.trf.xlu2 }
 0x10a   : > { %411 = vst.msk [vmem:[%s706_s19 + $0x248] sm:$0xff] %vm337_vm0, %v298_v31 }
 0x10b   : > { %v233_v32 = vpop.trf.xlu1  ;;  %v169_v33 = vpop.trf.xlu0 }
 0x10c   : > { %378 = vst.msk [vmem:[%s706_s19 + $0x140] sm:$0xff] %vm337_vm0, %v233_v32 }
 0x10d   : > { %346 = vst.msk [vmem:[%s706_s19 + $0x40] sm:$0xff] %vm337_vm0, %v169_v33 }
 0x111   : > { %v299_v34 = vpop.trf.xlu2 }
 0x112   : > { %412 = vst.msk [vmem:[%s706_s19 + $0x250] sm:$0xff] %vm337_vm0, %v299_v34 }
 0x113   : > { %v234_v35 = vpop.trf.xlu1  ;;  %v170_v36 = vpop.trf.xlu0 }
 0x114   : > { %379 = vst.msk [vmem:[%s706_s19 + $0x148] sm:$0xff] %vm337_vm0, %v234_v35 }
 0x115   : > { %347 = vst.msk [vmem:[%s706_s19 + $0x48] sm:$0xff] %vm337_vm0, %v170_v36 }
 0x119   : > { %v300_v37 = vpop.trf.xlu2 }
 0x11a   : > { %413 = vst.msk [vmem:[%s706_s19 + $0x258] sm:$0xff] %vm337_vm0, %v300_v37 }
 0x11b   : > { %v235_v38 = vpop.trf.xlu1  ;;  %v171_v39 = vpop.trf.xlu0 }
 0x11c   : > { %380 = vst.msk [vmem:[%s706_s19 + $0x150] sm:$0xff] %vm337_vm0, %v235_v38 }
 0x11d   : > { %348 = vst.msk [vmem:[%s706_s19 + $0x50] sm:$0xff] %vm337_vm0, %v171_v39 }
 0x121   : > { %v301_v40 = vpop.trf.xlu2 }
 0x122   : > { %414 = vst.msk [vmem:[%s706_s19 + $0x260] sm:$0xff] %vm337_vm0, %v301_v40 }
 0x123   : > { %v236_v41 = vpop.trf.xlu1  ;;  %v172_v42 = vpop.trf.xlu0 }
 0x124   : > { %381 = vst.msk [vmem:[%s706_s19 + $0x158] sm:$0xff] %vm337_vm0, %v236_v41 }
 0x125   : > { %349 = vst.msk [vmem:[%s706_s19 + $0x58] sm:$0xff] %vm337_vm0, %v172_v42 }
 0x129   : > { %v302_v43 = vpop.trf.xlu2 }
 0x12a   : > { %415 = vst.msk [vmem:[%s706_s19 + $0x268] sm:$0xff] %vm337_vm0, %v302_v43 }
 0x12b   : > { %v237_v44 = vpop.trf.xlu1  ;;  %v173_v45 = vpop.trf.xlu0 }
 0x12c   : > { %382 = vst.msk [vmem:[%s706_s19 + $0x160] sm:$0xff] %vm337_vm0, %v237_v44 }
 0x12d   : > { %350 = vst.msk [vmem:[%s706_s19 + $0x60] sm:$0xff] %vm337_vm0, %v173_v45 }
 0x131   : > { %v303_v46 = vpop.trf.xlu2 }
 0x132   : > { %416 = vst.msk [vmem:[%s706_s19 + $0x270] sm:$0xff] %vm337_vm0, %v303_v46 }
 0x133   : > { %v238_v47 = vpop.trf.xlu1  ;;  %v174_v48 = vpop.trf.xlu0 }
 0x134   : > { %383 = vst.msk [vmem:[%s706_s19 + $0x168] sm:$0xff] %vm337_vm0, %v238_v47 }
 0x135   : > { %351 = vst.msk [vmem:[%s706_s19 + $0x68] sm:$0xff] %vm337_vm0, %v174_v48 }
 0x139   : > { %v304_v49 = vpop.trf.xlu2 }
 0x13a   : > { %417 = vst.msk [vmem:[%s706_s19 + $0x278] sm:$0xff] %vm337_vm0, %v304_v49 }
 0x13b   : > { %v239_v50 = vpop.trf.xlu1  ;;  %v175_v51 = vpop.trf.xlu0 }
 0x13c   : > { %384 = vst.msk [vmem:[%s706_s19 + $0x170] sm:$0xff] %vm337_vm0, %v239_v50 }
 0x13d   : > { %352 = vst.msk [vmem:[%s706_s19 + $0x70] sm:$0xff] %vm337_vm0, %v175_v51 }
 0x141   : > { %v321_v52 = vpop.trf.xlu2 }
 0x142   : > { %418 = vst.msk [vmem:[%s706_s19 + $0x280] sm:$0xff] %vm337_vm0, %v321_v52 }
 0x143   : > { %v240_v53 = vpop.trf.xlu1  ;;  %v176_v54 = vpop.trf.xlu0 }
 0x144   : > { %385 = vst.msk [vmem:[%s706_s19 + $0x178] sm:$0xff] %vm337_vm0, %v240_v53 }
 0x145   : > { %353 = vst.msk [vmem:[%s706_s19 + $0x78] sm:$0xff] %vm337_vm0, %v176_v54 }
 0x149   : > { %v322_v55 = vpop.trf.xlu2 }
 0x14a   : > { %419 = vst.msk [vmem:[%s706_s19 + $0x288] sm:$0xff] %vm337_vm0, %v322_v55 }
 0x14b   : > { %v257_v56 = vpop.trf.xlu1  ;;  %v193_v57 = vpop.trf.xlu0 }
 0x14c   : > { %386 = vst.msk [vmem:[%s706_s19 + $0x180] sm:$0xff] %vm337_vm0, %v257_v56 }
 0x14d   : > { %354 = vst.msk [vmem:[%s706_s19 + $0x80] sm:$0xff] %vm337_vm0, %v193_v57 }
 0x151   : > { %v323_v58 = vpop.trf.xlu2 }
 0x152   : > { %420 = vst.msk [vmem:[%s706_s19 + $0x290] sm:$0xff] %vm337_vm0, %v323_v58 }
 0x153   : > { %v258_v59 = vpop.trf.xlu1  ;;  %v194_v60 = vpop.trf.xlu0 }
 0x154   : > { %387 = vst.msk [vmem:[%s706_s19 + $0x188] sm:$0xff] %vm337_vm0, %v258_v59 }
 0x155   : > { %355 = vst.msk [vmem:[%s706_s19 + $0x88] sm:$0xff] %vm337_vm0, %v194_v60 }
 0x159   : > { %v324_v61 = vpop.trf.xlu2 }
 0x15a   : > { %421 = vst.msk [vmem:[%s706_s19 + $0x298] sm:$0xff] %vm337_vm0, %v324_v61 }
 0x15b   : > { %v259_v62 = vpop.trf.xlu1  ;;  %v195_v63 = vpop.trf.xlu0 }
 0x15c   : > { %388 = vst.msk [vmem:[%s706_s19 + $0x190] sm:$0xff] %vm337_vm0, %v259_v62 }
 0x15d   : > { %356 = vst.msk [vmem:[%s706_s19 + $0x90] sm:$0xff] %vm337_vm0, %v195_v63 }
 0x161   : > { %v325_v0 = vpop.trf.xlu2 }
 0x162   : > { %422 = vst.msk [vmem:[%s706_s19 + $0x2a0] sm:$0xff] %vm337_vm0, %v325_v0 }
 0x163   : > { %v260_v1 = vpop.trf.xlu1  ;;  %v196_v2 = vpop.trf.xlu0 }
 0x164   : > { %389 = vst.msk [vmem:[%s706_s19 + $0x198] sm:$0xff] %vm337_vm0, %v260_v1 }
 0x165   : > { %357 = vst.msk [vmem:[%s706_s19 + $0x98] sm:$0xff] %vm337_vm0, %v196_v2 }
 0x169   : > { %v326_v3 = vpop.trf.xlu2 }
 0x16a   : > { %423 = vst.msk [vmem:[%s706_s19 + $0x2a8] sm:$0xff] %vm337_vm0, %v326_v3 }
 0x16b   : > { %v261_v4 = vpop.trf.xlu1  ;;  %v197_v5 = vpop.trf.xlu0 }
 0x16c   : > { %390 = vst.msk [vmem:[%s706_s19 + $0x1a0] sm:$0xff] %vm337_vm0, %v261_v4 }
 0x16d   : > { %358 = vst.msk [vmem:[%s706_s19 + $0xa0] sm:$0xff] %vm337_vm0, %v197_v5 }
 0x171   : > { %v327_v6 = vpop.trf.xlu2 }
 0x172   : > { %424 = vst.msk [vmem:[%s706_s19 + $0x2b0] sm:$0xff] %vm337_vm0, %v327_v6 }
 0x173   : > { %v262_v7 = vpop.trf.xlu1  ;;  %v198_v8 = vpop.trf.xlu0 }
 0x174   : > { %391 = vst.msk [vmem:[%s706_s19 + $0x1a8] sm:$0xff] %vm337_vm0, %v262_v7 }
 0x175   : > { %359 = vst.msk [vmem:[%s706_s19 + $0xa8] sm:$0xff] %vm337_vm0, %v198_v8 }
 0x179   : > { %v328_v9 = vpop.trf.xlu2 }
 0x17a   : > { %425 = vst.msk [vmem:[%s706_s19 + $0x2b8] sm:$0xff] %vm337_vm0, %v328_v9 }
 0x17b   : > { %v263_v10 = vpop.trf.xlu1  ;;  %v199_v11 = vpop.trf.xlu0 }
 0x17c   : > { %392 = vst.msk [vmem:[%s706_s19 + $0x1b0] sm:$0xff] %vm337_vm0, %v263_v10 }
 0x17d   : > { %360 = vst.msk [vmem:[%s706_s19 + $0xb0] sm:$0xff] %vm337_vm0, %v199_v11 }
 0x181   : > { %v329_v12 = vpop.trf.xlu2 }
 0x182   : > { %426 = vst.msk [vmem:[%s706_s19 + $0x2c0] sm:$0xff] %vm337_vm0, %v329_v12 }
 0x183   : > { %v264_v13 = vpop.trf.xlu1  ;;  %v200_v14 = vpop.trf.xlu0 }
 0x184   : > { %393 = vst.msk [vmem:[%s706_s19 + $0x1b8] sm:$0xff] %vm337_vm0, %v264_v13 }
 0x185   : > { %361 = vst.msk [vmem:[%s706_s19 + $0xb8] sm:$0xff] %vm337_vm0, %v200_v14 }
 0x189   : > { %v330_v15 = vpop.trf.xlu2 }
 0x18a   : > { %427 = vst.msk [vmem:[%s706_s19 + $0x2c8] sm:$0xff] %vm337_vm0, %v330_v15 }
 0x18b   : > { %v265_v16 = vpop.trf.xlu1  ;;  %v201_v17 = vpop.trf.xlu0 }
 0x18c   : > { %394 = vst.msk [vmem:[%s706_s19 + $0x1c0] sm:$0xff] %vm337_vm0, %v265_v16 }
 0x18d   : > { %362 = vst.msk [vmem:[%s706_s19 + $0xc0] sm:$0xff] %vm337_vm0, %v201_v17 }
 0x191   : > { %v331_v18 = vpop.trf.xlu2 }
 0x192   : > { %428 = vst.msk [vmem:[%s706_s19 + $0x2d0] sm:$0xff] %vm337_vm0, %v331_v18 }
 0x193   : > { %v266_v19 = vpop.trf.xlu1  ;;  %v202_v20 = vpop.trf.xlu0 }
 0x194   : > { %395 = vst.msk [vmem:[%s706_s19 + $0x1c8] sm:$0xff] %vm337_vm0, %v266_v19 }
 0x195   : > { %363 = vst.msk [vmem:[%s706_s19 + $0xc8] sm:$0xff] %vm337_vm0, %v202_v20 }
 0x199   : > { %v332_v21 = vpop.trf.xlu2 }
 0x19a   : > { %429 = vst.msk [vmem:[%s706_s19 + $0x2d8] sm:$0xff] %vm337_vm0, %v332_v21 }
 0x19b   : > { %v267_v22 = vpop.trf.xlu1  ;;  %v203_v23 = vpop.trf.xlu0 }
 0x19c   : > { %396 = vst.msk [vmem:[%s706_s19 + $0x1d0] sm:$0xff] %vm337_vm0, %v267_v22 }
 0x19d   : > { %364 = vst.msk [vmem:[%s706_s19 + $0xd0] sm:$0xff] %vm337_vm0, %v203_v23 }
 0x1a1   : > { %v333_v24 = vpop.trf.xlu2 }
 0x1a2   : > { %430 = vst.msk [vmem:[%s706_s19 + $0x2e0] sm:$0xff] %vm337_vm0, %v333_v24 }
 0x1a3   : > { %v268_v25 = vpop.trf.xlu1  ;;  %v204_v26 = vpop.trf.xlu0 }
 0x1a4   : > { %397 = vst.msk [vmem:[%s706_s19 + $0x1d8] sm:$0xff] %vm337_vm0, %v268_v25 }
 0x1a5   : > { %365 = vst.msk [vmem:[%s706_s19 + $0xd8] sm:$0xff] %vm337_vm0, %v204_v26 }
 0x1a9   : > { %v334_v27 = vpop.trf.xlu2 }
 0x1aa   : > { %431 = vst.msk [vmem:[%s706_s19 + $0x2e8] sm:$0xff] %vm337_vm0, %v334_v27 }
 0x1ab   : > { %v269_v28 = vpop.trf.xlu1  ;;  %v205_v29 = vpop.trf.xlu0 }
 0x1ac   : > { %398 = vst.msk [vmem:[%s706_s19 + $0x1e0] sm:$0xff] %vm337_vm0, %v269_v28 }
 0x1ad   : > { %366 = vst.msk [vmem:[%s706_s19 + $0xe0] sm:$0xff] %vm337_vm0, %v205_v29 }
 0x1b1   : > { %v335_v30 = vpop.trf.xlu2 }
 0x1b2   : > { %432 = vst.msk [vmem:[%s706_s19 + $0x2f0] sm:$0xff] %vm337_vm0, %v335_v30 }
 0x1b3   : > { %v270_v31 = vpop.trf.xlu1  ;;  %v206_v32 = vpop.trf.xlu0 }
 0x1b4   : > { %399 = vst.msk [vmem:[%s706_s19 + $0x1e8] sm:$0xff] %vm337_vm0, %v270_v31 }
 0x1b5   : > { %367 = vst.msk [vmem:[%s706_s19 + $0xe8] sm:$0xff] %vm337_vm0, %v206_v32 }
 0x1b9   : > { %v336_v33 = vpop.trf.xlu2 }
 0x1ba   : > { %433 = vst.msk [vmem:[%s706_s19 + $0x2f8] sm:$0xff] %vm337_vm0, %v336_v33 }
 0x1bb   : > { %v271_v34 = vpop.trf.xlu1  ;;  %v207_v35 = vpop.trf.xlu0 }
 0x1bc   : > { %400 = vst.msk [vmem:[%s706_s19 + $0x1f0] sm:$0xff] %vm337_vm0, %v271_v34 }
 0x1bd   : > { %368 = vst.msk [vmem:[%s706_s19 + $0xf0] sm:$0xff] %vm337_vm0, %v207_v35 }
 0x1c3   : > { %v272_v36 = vpop.trf.xlu1  ;;  %v208_v37 = vpop.trf.xlu0 }
 0x1c4   : > { %401 = vst.msk [vmem:[%s706_s19 + $0x1f8] sm:$0xff] %vm337_vm0, %v272_v36 }
 0x1c5   : > { %369 = vst.msk [vmem:[%s706_s19 + $0xf8] sm:$0xff] %vm337_vm0, %v208_v37 }
 0x1c6 PF: > { %p11_p7 = scmp.ge.s32.totalorder %s655_s11, 4   ;;  %s917_s6 = smov %s611_s7 }
 0x1c7   : > { %s918_s7 = smov %s615_s8  ;;  %s919_s8 = smov %s665_s14 }
 0x1c8   : > { %s920_s9 = smov %s655_s11  ;;  %13 = sbr.rel (!%p11_p7) target bundleno = 3 (0x3), region = 64 }
 0x1cd   :  { %455 = vsyncpa [#allocation3], 1 }
 0x1ce   :  { %457 = vsyncpa [#allocation3 + $0x1], 1 }

</bundles_post_ra>
